<compile_context>
chip_gen: v7x
topology: tpu7x:2x2x1
jax: 0.10.0
libtpu: 0.0.40
codegen_flags: <defaults>
</compile_context>

<pallas_src>
import math

import jax
import jax.numpy as jnp
from jax.experimental import pallas as pl
from jax.experimental.pallas import tpu as pltpu

LOGSTD_MAX = 2.0
LOGSTD_MIN = -10.0


def _round_up(x: int, m: int) -> int:
    return ((x + m - 1) // m) * m


def _pad_to(x, target_shape):
    pads = [(0, t - s) for s, t in zip(x.shape, target_shape)]
    if all(p == (0, 0) for p in pads):
        return x
    return jnp.pad(x, pads)


# ----------------------------------------------------------------------------
# Kernel
# ----------------------------------------------------------------------------
def _action_seq_kernel(x_ref, w1_ref, b1_ref,
                       w2m_ref, b2m_ref, w2s_ref, b2s_ref,
                       mean_ref, std_ref, h_ref):
    """One (batch tile, head-column tile) grid step.

    x_ref:   [TB, obs_dim]
    w1_ref:  [obs_dim, hid_p]    b1_ref:  [1, hid_p]
    w2m_ref: [hid_p, TN]         b2m_ref: [1, TN]
    w2s_ref: [hid_p, TN]         b2s_ref: [1, TN]
    mean_ref / std_ref: [TB, TN]
    h_ref:   [TB, hid_p] VMEM scratch (hidden activation, reused across j).
    """
    j = pl.program_id(1)

    # Hidden layer once per batch tile (j == 0); reused for all head-column tiles.
    @pl.when(j == 0)
    def _():
        h = jnp.dot(x_ref[...], w1_ref[...],
                    preferred_element_type=jnp.float32) + b1_ref[...]
        h_ref[...] = jnp.maximum(h, 0.0)

    h = h_ref[...]

    # Two head matmuls -> no mid-vreg lane slicing; lane-dense outputs.
    mean_pre = jnp.dot(h, w2m_ref[...], preferred_element_type=jnp.float32) + b2m_ref[...]
    std_pre = jnp.dot(h, w2s_ref[...], preferred_element_type=jnp.float32) + b2s_ref[...]

    mean_ref[...] = jnp.tanh(mean_pre)
    std_ref[...] = jnp.exp(jnp.clip(std_pre, LOGSTD_MIN, LOGSTD_MAX))


# ----------------------------------------------------------------------------
# One-time parameter preparation (hoisted out of the per-call path)
# ----------------------------------------------------------------------------
def prepare_params(w1, b1, w2, b2, segment_len, action_dim):
    """Split the output head, cast to f32, and zero-pad lane dims to 128 ONCE."""
    obs_dim, hidden = w1.shape
    half = segment_len * action_dim
    assert w2.shape[1] == 2 * half

    hid_p = _round_up(hidden, 128)
    half_p = _round_up(half, 128)

    b1 = b1.reshape(1, -1)
    b2 = b2.reshape(1, -1)
    w2m, w2s = w2[:, :half], w2[:, half:]
    b2m, b2s = b2[:, :half], b2[:, half:]

    return dict(
        w1=_pad_to(w1.astype(jnp.float32), (obs_dim, hid_p)),
        b1=_pad_to(b1.astype(jnp.float32), (1, hid_p)),
        w2m=_pad_to(w2m.astype(jnp.float32), (hid_p, half_p)),
        b2m=_pad_to(b2m.astype(jnp.float32), (1, half_p)),
        w2s=_pad_to(w2s.astype(jnp.float32), (hid_p, half_p)),
        b2s=_pad_to(b2s.astype(jnp.float32), (1, half_p)),
        obs_dim=obs_dim, hidden=hidden, half=half,
        hid_p=hid_p, half_p=half_p,
        segment_len=segment_len, action_dim=action_dim,
    )


# ----------------------------------------------------------------------------
# VMEM budgeting / tiling heuristics
# ----------------------------------------------------------------------------
def _vmem_needed(tb, obs_dim, hid_p, tn, weight_bufs, head_bufs):
    f32 = 4
    act = 2 * (tb * obs_dim + 2 * tb * tn) * f32           # double-buffered obs + mean + std blocks
    w1b1 = weight_bufs * (obs_dim * hid_p + hid_p) * f32    # resident hidden-layer weights
    heads = head_bufs * 2 * (hid_p * tn + tn) * f32         # mean/std head weight column blocks
    scratch = tb * hid_p * f32                               # hidden activation scratch
    return act + w1b1 + heads + scratch


def _choose_head_tile(tb, obs_dim, hid_p, half_p, weight_bufs, vmem_budget):
    """Largest 128-multiple column tile of the head weights that fits VMEM."""
    units = half_p // 128
    for d in range(units, 0, -1):
        if units % d:
            continue
        tn = 128 * d
        head_bufs = weight_bufs if tn == half_p else 2
        if _vmem_needed(tb, obs_dim, hid_p, tn, weight_bufs, head_bufs) <= vmem_budget:
            return tn
    return 128  # smallest legal tile; compiler will report if even this is too big


def _vmem_budget_bytes():
    try:
        cap = int(pltpu.get_tpu_info().vmem_capacity_bytes)
    except Exception:
        cap = 64 * 1024 * 1024  # conservative (v7x per-TC) fallback
    return int(0.9 * cap)       # leave headroom for Mosaic internal scratch/semaphores


# ----------------------------------------------------------------------------
# Forward
# ----------------------------------------------------------------------------
def _forward_impl(obs, params, *, head_block_cols, single_buffer_weights):
    assert obs.ndim == 2
    batch, obs_dim = obs.shape
    assert obs_dim == params["obs_dim"]

    hid_p, half_p, half = params["hid_p"], params["half_p"], params["half"]
    seg, act = params["segment_len"], params["action_dim"]

    # Batch tile: 256 fills the 256-wide MXU (v6e/v7x) while keeping >=2 grid
    # steps for megacore sharding; 128 for medium batches; sublane-rounded small.
    if batch >= 512:
        tb = 256
    elif batch >= 128:
        tb = 128
    else:
        tb = _round_up(batch, 8)
    batch_p = _round_up(batch, tb)

    weight_bufs = 1 if single_buffer_weights else 2
    vmem_budget = _vmem_budget_bytes()

    if head_block_cols is not None:
        assert head_block_cols % 128 == 0 and half_p % head_block_cols == 0
        tn = head_block_cols
    else:
        tn = _choose_head_tile(tb, obs_dim, hid_p, half_p, weight_bufs, vmem_budget)
    n_half = half_p // tn
    head_bufs = weight_bufs if n_half == 1 else 2

    needed = _vmem_needed(tb, obs_dim, hid_p, tn, weight_bufs, head_bufs)
    vmem_limit = max(1 << 20, min(vmem_budget, needed + (8 << 20)))

    # Only the small streamed obs tensor is touched per call (batch padding only).
    obs_pad = _pad_to(obs.astype(jnp.float32), (batch_p, obs_dim))

    def wspec(shape, index_map, single):
        if single:
            # Constant-index blocks never re-DMA -> single-buffer them to save VMEM.
            return pl.BlockSpec(shape, index_map, pipeline_mode=pl.Buffered(1))
        return pl.BlockSpec(shape, index_map)

    single_w = single_buffer_weights             # w1/b1 are always constant-index
    single_h = single_buffer_weights and n_half == 1  # heads constant only if untiled

    in_specs = [
        pl.BlockSpec((tb, obs_dim), lambda i, j: (i, 0)),          # obs (pipelined)
        wspec((obs_dim, hid_p), lambda i, j: (0, 0), single_w),    # w1 (resident)
        wspec((1, hid_p), lambda i, j: (0, 0), single_w),          # b1
        wspec((hid_p, tn), lambda i, j: (0, j), single_h),         # w2_mean
        wspec((1, tn), lambda i, j: (0, j), single_h),             # b2_mean
        wspec((hid_p, tn), lambda i, j: (0, j), single_h),         # w2_std
        wspec((1, tn), lambda i, j: (0, j), single_h),             # b2_std
    ]
    out_specs = (
        pl.BlockSpec((tb, tn), lambda i, j: (i, j)),               # mean (pipelined)
        pl.BlockSpec((tb, tn), lambda i, j: (i, j)),               # std  (pipelined)
    )

    f32 = 4
    cost = pl.CostEstimate(
        flops=2 * batch_p * (obs_dim * hid_p + 2 * hid_p * half_p),
        transcendentals=batch_p * 2 * half_p,
        bytes_accessed=(
            batch_p * obs_dim * f32
            + (obs_dim * hid_p + hid_p + 2 * (hid_p * half_p + half_p)) * f32
            + 2 * batch_p * half_p * f32
        ),
    )

    mean_flat, std_flat = pl.pallas_call(
        _action_seq_kernel,
        out_shape=(
            jax.ShapeDtypeStruct((batch_p, half_p), jnp.float32),
            jax.ShapeDtypeStruct((batch_p, half_p), jnp.float32),
        ),
        grid=(batch_p // tb, n_half),
        in_specs=in_specs,
        out_specs=out_specs,
        scratch_shapes=[pltpu.VMEM((tb, hid_p), jnp.float32)],     # hidden activation
        compiler_params=pltpu.CompilerParams(
            dimension_semantics=("parallel", "arbitrary"),
            vmem_limit_bytes=vmem_limit,
        ),
        cost_estimate=cost,
    )(obs_pad, params["w1"], params["b1"],
      params["w2m"], params["b2m"], params["w2s"], params["b2s"])

    # Un-pad BEFORE reshaping to [B, seg, act]; padded lanes (tanh(0)=0, exp(0)=1)
    # and padded batch rows are sliced off here.
    mean = mean_flat[:batch, :half].reshape(batch, seg, act)
    std = std_flat[:batch, :half].reshape(batch, seg, act)
    return mean, std


# If this jax build rejects pl.Buffered(1) for the implicit pipeline, fall back
# once to default double-buffered weight blocks (identical numerics).
_SINGLE_BUFFER_OK = [True]


def action_sequence_forward(obs, params, *, head_block_cols=None):
    """Returns (mean, std), each [B, segment_len, action_dim]."""
    if _SINGLE_BUFFER_OK[0]:
        try:
            return _forward_impl(obs, params, head_block_cols=head_block_cols,
                                 single_buffer_weights=True)
        except Exception:
            _SINGLE_BUFFER_OK[0] = False
    return _forward_impl(obs, params, head_block_cols=head_block_cols,
                         single_buffer_weights=False)


# ----------------------------------------------------------------------------
# Synthetic init + self-check
# ----------------------------------------------------------------------------
def init_params(key, obs_dim, hidden_dim, segment_len, action_dim):
    """Deterministic synthetic parameter init (PyTorch-like uniform fan-in scaling)."""
    out_dim = 2 * segment_len * action_dim
    k1, k2, k3, k4 = jax.random.split(key, 4)
    bound1 = 1.0 / math.sqrt(obs_dim)
    bound2 = 1.0 / math.sqrt(hidden_dim)
    w1 = jax.random.uniform(k1, (obs_dim, hidden_dim), jnp.float32, -bound1, bound1)
    b1 = jax.random.uniform(k2, (1, hidden_dim), jnp.float32, -bound1, bound1)
    w2 = jax.random.uniform(k3, (hidden_dim, out_dim), jnp.float32, -bound2, bound2)
    b2 = jax.random.uniform(k4, (1, out_dim), jnp.float32, -bound2, bound2)
    return w1, b1, w2, b2


def _reference(obs, w1, b1, w2, b2, seg, act):
    h = jnp.maximum(obs @ w1 + b1, 0.0)
    out = h @ w2 + b2
    half = seg * act
    mean = jnp.tanh(out[:, :half]).reshape(obs.shape[0], seg, act)
    std = jnp.exp(jnp.clip(out[:, half:], LOGSTD_MIN, LOGSTD_MAX)).reshape(
        obs.shape[0], seg, act)
    return mean, std


# TODO(synk): the PyTorch module's AdamW optimizer and D.Independent(Normal) helpers
# are training/sampling utilities outside forward(); only forward() is kernelized.

if __name__ == "__main__":
    # Small shapes consistent with the module's forward: obs is [B, obs_dim].
    batch, obs_dim, hidden_dim, segment_len, action_dim = 2, 16, 32, 8, 4

    key = jax.random.PRNGKey(0)
    k_obs, k_params = jax.random.split(key)
    obs = jax.random.normal(k_obs, (batch, obs_dim), jnp.float32)
    w1, b1, w2, b2 = init_params(k_params, obs_dim, hidden_dim, segment_len, action_dim)

    # One-time parameter prep (pad/split/cast hoisted out of the per-call path).
    params = prepare_params(w1, b1, w2, b2, segment_len, action_dim)

    mean, std = action_sequence_forward(obs, params)
    jax.block_until_ready((mean, std))

    mean_ref, std_ref = _reference(obs, w1, b1, w2, b2, segment_len, action_dim)
    assert mean.shape == (batch, segment_len, action_dim)
    assert std.shape == (batch, segment_len, action_dim)
    assert jnp.allclose(mean, mean_ref, atol=1e-5, rtol=1e-5)
    assert jnp.allclose(std, std_ref, atol=1e-5, rtol=1e-5)

    # Larger-batch sanity check (batch grid / pipelining / ragged batch tail).
    big_batch = 260
    obs_big = jax.random.normal(jax.random.PRNGKey(7), (big_batch, obs_dim), jnp.float32)
    mean_b, std_b = action_sequence_forward(obs_big, params)
    jax.block_until_ready((mean_b, std_b))
    mean_b_ref, std_b_ref = _reference(obs_big, w1, b1, w2, b2, segment_len, action_dim)
    assert jnp.allclose(mean_b, mean_b_ref, atol=1e-5, rtol=1e-5)
    assert jnp.allclose(std_b, std_b_ref, atol=1e-5, rtol=1e-5)

    # Forced head-column tiling path (the large-width VMEM fallback on v7x):
    # half = 16*16 = 256 -> two 128-wide head column tiles, hidden reused from scratch.
    seg2, act2 = 16, 16
    w1c, b1c, w2c, b2c = init_params(jax.random.PRNGKey(3), obs_dim, hidden_dim, seg2, act2)
    params_c = prepare_params(w1c, b1c, w2c, b2c, seg2, act2)
    obs_c = jax.random.normal(jax.random.PRNGKey(11), (9, obs_dim), jnp.float32)
    mean_c, std_c = action_sequence_forward(obs_c, params_c, head_block_cols=128)
    jax.block_until_ready((mean_c, std_c))
    mean_c_ref, std_c_ref = _reference(obs_c, w1c, b1c, w2c, b2c, seg2, act2)
    assert jnp.allclose(mean_c, mean_c_ref, atol=1e-5, rtol=1e-5)
    assert jnp.allclose(std_c, std_c_ref, atol=1e-5, rtol=1e-5)

    print("KERNEL_OK")
</pallas_src>

<mosaic_0001>
module attributes {stable_mosaic.version = 11 : i64} {
  func.func @_action_seq_kernel(%arg0: i32, %arg1: i32, %arg2: memref<8x16xf32, #tpu.memory_space<vmem>>, %arg3: memref<16x128xf32, #tpu.memory_space<vmem>>, %arg4: memref<1x128xf32, #tpu.memory_space<vmem>>, %arg5: memref<128x128xf32, #tpu.memory_space<vmem>>, %arg6: memref<1x128xf32, #tpu.memory_space<vmem>>, %arg7: memref<128x128xf32, #tpu.memory_space<vmem>>, %arg8: memref<1x128xf32, #tpu.memory_space<vmem>>, %arg9: memref<8x128xf32, #tpu.memory_space<vmem>>, %arg10: memref<8x128xf32, #tpu.memory_space<vmem>>, %arg11: memref<8x128xf32, #tpu.memory_space<vmem>>) attributes {dimension_semantics = [#tpu.dimension_semantics<parallel>, #tpu.dimension_semantics<arbitrary>], iteration_bounds = array<i64: 1, 1>, scalar_prefetch = 0 : i64, scratch_operands = 1 : i64, tpu.core_type = #tpu.core_type<tc>, window_params = [{transform_indices = @transform_0, window_bounds = array<i64: 8, 16>}, {pipeline_mode = #tpu.pipeline_mode<synchronous>, transform_indices = @transform_1, window_bounds = array<i64: 16, 128>}, {pipeline_mode = #tpu.pipeline_mode<synchronous>, transform_indices = @transform_2, window_bounds = array<i64: 1, 128>}, {pipeline_mode = #tpu.pipeline_mode<synchronous>, transform_indices = @transform_3, window_bounds = array<i64: 128, 128>}, {pipeline_mode = #tpu.pipeline_mode<synchronous>, transform_indices = @transform_4, window_bounds = array<i64: 1, 128>}, {pipeline_mode = #tpu.pipeline_mode<synchronous>, transform_indices = @transform_5, window_bounds = array<i64: 128, 128>}, {pipeline_mode = #tpu.pipeline_mode<synchronous>, transform_indices = @transform_6, window_bounds = array<i64: 1, 128>}, {transform_indices = @transform_7, window_bounds = array<i64: 8, 128>}, {transform_indices = @transform_8, window_bounds = array<i64: 8, 128>}]} {
    %c0_i32 = arith.constant 0 : i32
    %0 = arith.cmpi eq, %arg1, %c0_i32 : i32
    %1 = arith.extui %0 : i1 to i32
    %c0_i32_0 = arith.constant 0 : i32
    %2 = arith.cmpi ne, %1, %c0_i32_0 : i32
    scf.if %2 {
      %c0_17 = arith.constant 0 : index
      %c0_18 = arith.constant 0 : index
      %22 = vector.load %arg2[%c0_17, %c0_18] : memref<8x16xf32, #tpu.memory_space<vmem>>, vector<8x16xf32>
      %c0_19 = arith.constant 0 : index
      %c0_20 = arith.constant 0 : index
      %23 = vector.load %arg3[%c0_19, %c0_20] : memref<16x128xf32, #tpu.memory_space<vmem>>, vector<16x128xf32>
      %cst_21 = arith.constant dense<0.000000e+00> : vector<8x128xf32>
      %24 = tpu.matmul %22, %23, %cst_21 {dimension_numbers = #tpu.dot_dimension_numbers<[1], [0], [0], [1], [0, 0, 1, 1], [], []>} : vector<8x16xf32>, vector<16x128xf32>, vector<8x128xf32> -> vector<8x128xf32>
      %c0_22 = arith.constant 0 : index
      %c0_23 = arith.constant 0 : index
      %25 = vector.load %arg4[%c0_22, %c0_23] : memref<1x128xf32, #tpu.memory_space<vmem>>, vector<1x128xf32>
      %26 = vector.broadcast %25 : vector<1x128xf32> to vector<8x128xf32>
      %27 = arith.addf %24, %26 : vector<8x128xf32>
      %cst_24 = arith.constant 0.000000e+00 : f32
      %28 = vector.broadcast %cst_24 : f32 to vector<8x128xf32>
      %29 = arith.maximumf %27, %28 : vector<8x128xf32>
      %c0_25 = arith.constant 0 : index
      %c0_26 = arith.constant 0 : index
      %30 = vector.load %arg11[%c0_25, %c0_26] : memref<8x128xf32, #tpu.memory_space<vmem>>, vector<8x128xf32>
      tpu.vector_store %arg11[%c0_25, %c0_26], %29 {strides = array<i32>} : memref<8x128xf32, #tpu.memory_space<vmem>>, vector<8x128xf32>,
    } else {
    }
    %c0 = arith.constant 0 : index
    %c0_1 = arith.constant 0 : index
    %3 = vector.load %arg11[%c0, %c0_1] : memref<8x128xf32, #tpu.memory_space<vmem>>, vector<8x128xf32>
    %c0_2 = arith.constant 0 : index
    %c0_3 = arith.constant 0 : index
    %4 = vector.load %arg5[%c0_2, %c0_3] : memref<128x128xf32, #tpu.memory_space<vmem>>, vector<128x128xf32>
    %cst = arith.constant dense<0.000000e+00> : vector<8x128xf32>
    %5 = tpu.matmul %3, %4, %cst {dimension_numbers = #tpu.dot_dimension_numbers<[1], [0], [0], [1], [0, 0, 1, 1], [], []>} : vector<8x128xf32>, vector<128x128xf32>, vector<8x128xf32> -> vector<8x128xf32>
    %c0_4 = arith.constant 0 : index
    %c0_5 = arith.constant 0 : index
    %6 = vector.load %arg6[%c0_4, %c0_5] : memref<1x128xf32, #tpu.memory_space<vmem>>, vector<1x128xf32>
    %7 = vector.broadcast %6 : vector<1x128xf32> to vector<8x128xf32>
    %8 = arith.addf %5, %7 : vector<8x128xf32>
    %c0_6 = arith.constant 0 : index
    %c0_7 = arith.constant 0 : index
    %9 = vector.load %arg7[%c0_6, %c0_7] : memref<128x128xf32, #tpu.memory_space<vmem>>, vector<128x128xf32>
    %cst_8 = arith.constant dense<0.000000e+00> : vector<8x128xf32>
    %10 = tpu.matmul %3, %9, %cst_8 {dimension_numbers = #tpu.dot_dimension_numbers<[1], [0], [0], [1], [0, 0, 1, 1], [], []>} : vector<8x128xf32>, vector<128x128xf32>, vector<8x128xf32> -> vector<8x128xf32>
    %c0_9 = arith.constant 0 : index
    %c0_10 = arith.constant 0 : index
    %11 = vector.load %arg8[%c0_9, %c0_10] : memref<1x128xf32, #tpu.memory_space<vmem>>, vector<1x128xf32>
    %12 = vector.broadcast %11 : vector<1x128xf32> to vector<8x128xf32>
    %13 = arith.addf %10, %12 : vector<8x128xf32>
    %14 = math.tanh %8 : vector<8x128xf32>
    %c0_11 = arith.constant 0 : index
    %c0_12 = arith.constant 0 : index
    %15 = vector.load %arg9[%c0_11, %c0_12] : memref<8x128xf32, #tpu.memory_space<vmem>>, vector<8x128xf32>
    tpu.vector_store %arg9[%c0_11, %c0_12], %14 {strides = array<i32>} : memref<8x128xf32, #tpu.memory_space<vmem>>, vector<8x128xf32>,
    %cst_13 = arith.constant -1.000000e+01 : f32
    %cst_14 = arith.constant 2.000000e+00 : f32
    %16 = vector.broadcast %cst_13 : f32 to vector<8x128xf32>
    %17 = arith.maximumf %16, %13 : vector<8x128xf32>
    %18 = vector.broadcast %cst_14 : f32 to vector<8x128xf32>
    %19 = arith.minimumf %18, %17 : vector<8x128xf32>
    %20 = math.exp %19 : vector<8x128xf32>
    %c0_15 = arith.constant 0 : index
    %c0_16 = arith.constant 0 : index
    %21 = vector.load %arg10[%c0_15, %c0_16] : memref<8x128xf32, #tpu.memory_space<vmem>>, vector<8x128xf32>
    tpu.vector_store %arg10[%c0_15, %c0_16], %20 {strides = array<i32>} : memref<8x128xf32, #tpu.memory_space<vmem>>, vector<8x128xf32>,
    return
  }
  func.func @transform_0(%arg0: i32, %arg1: i32) -> (i32, i32) {
    %c0_i32 = arith.constant 0 : i32
    %c0_i32_0 = arith.constant 0 : i32
    return %arg0, %c0_i32 : i32, i32
  }
  func.func @transform_1(%arg0: i32, %arg1: i32) -> (i32, i32) {
    %c0_i32 = arith.constant 0 : i32
    %c0_i32_0 = arith.constant 0 : i32
    %c0_i32_1 = arith.constant 0 : i32
    return %c0_i32, %c0_i32_0 : i32, i32
  }
  func.func @transform_2(%arg0: i32, %arg1: i32) -> (i32, i32) {
    %c0_i32 = arith.constant 0 : i32
    %c0_i32_0 = arith.constant 0 : i32
    %c0_i32_1 = arith.constant 0 : i32
    return %c0_i32, %c0_i32_0 : i32, i32
  }
  func.func @transform_3(%arg0: i32, %arg1: i32) -> (i32, i32) {
    %c0_i32 = arith.constant 0 : i32
    %c0_i32_0 = arith.constant 0 : i32
    return %c0_i32, %arg1 : i32, i32
  }
  func.func @transform_4(%arg0: i32, %arg1: i32) -> (i32, i32) {
    %c0_i32 = arith.constant 0 : i32
    %c0_i32_0 = arith.constant 0 : i32
    return %c0_i32, %arg1 : i32, i32
  }
  func.func @transform_5(%arg0: i32, %arg1: i32) -> (i32, i32) {
    %c0_i32 = arith.constant 0 : i32
    %c0_i32_0 = arith.constant 0 : i32
    return %c0_i32, %arg1 : i32, i32
  }
  func.func @transform_6(%arg0: i32, %arg1: i32) -> (i32, i32) {
    %c0_i32 = arith.constant 0 : i32
    %c0_i32_0 = arith.constant 0 : i32
    return %c0_i32, %arg1 : i32, i32
  }
  func.func @transform_7(%arg0: i32, %arg1: i32) -> (i32, i32) {
    %c0_i32 = arith.constant 0 : i32
    return %arg0, %arg1 : i32, i32
  }
  func.func @transform_8(%arg0: i32, %arg1: i32) -> (i32, i32) {
    %c0_i32 = arith.constant 0 : i32
    return %arg0, %arg1 : i32, i32
  }
}

module attributes {stable_mosaic.version = 11 : i64} {
  func.func @_action_seq_kernel(%arg0: i32, %arg1: i32, %arg2: memref<8x16xf32, #tpu.memory_space<vmem>>, %arg3: memref<16x128xf32, #tpu.memory_space<vmem>>, %arg4: memref<1x128xf32, #tpu.memory_space<vmem>>, %arg5: memref<128x128xf32, #tpu.memory_space<vmem>>, %arg6: memref<1x128xf32, #tpu.memory_space<vmem>>, %arg7: memref<128x128xf32, #tpu.memory_space<vmem>>, %arg8: memref<1x128xf32, #tpu.memory_space<vmem>>, %arg9: memref<8x128xf32, #tpu.memory_space<vmem>>, %arg10: memref<8x128xf32, #tpu.memory_space<vmem>>, %arg11: memref<8x128xf32, #tpu.memory_space<vmem>>) attributes {dimension_semantics = [#tpu.dimension_semantics<parallel>, #tpu.dimension_semantics<arbitrary>], iteration_bounds = array<i64: 1, 1>, scalar_prefetch = 0 : i64, scratch_operands = 1 : i64, tpu.core_type = #tpu.core_type<tc>, window_params = [{transform_indices = @transform_0, window_bounds = array<i64: 8, 16>}, {pipeline_mode = #tpu.pipeline_mode<synchronous>, transform_indices = @transform_1, window_bounds = array<i64: 16, 128>}, {pipeline_mode = #tpu.pipeline_mode<synchronous>, transform_indices = @transform_2, window_bounds = array<i64: 1, 128>}, {transform_indices = @transform_3, window_bounds = array<i64: 128, 128>}, {transform_indices = @transform_4, window_bounds = array<i64: 1, 128>}, {transform_indices = @transform_5, window_bounds = array<i64: 128, 128>}, {transform_indices = @transform_6, window_bounds = array<i64: 1, 128>}, {transform_indices = @transform_7, window_bounds = array<i64: 8, 128>}, {transform_indices = @transform_8, window_bounds = array<i64: 8, 128>}]} {
    %c0_i32 = arith.constant 0 : i32
    %0 = arith.cmpi eq, %arg1, %c0_i32 : i32
    %1 = arith.extui %0 : i1 to i32
    %c0_i32_0 = arith.constant 0 : i32
    %2 = arith.cmpi ne, %1, %c0_i32_0 : i32
    scf.if %2 {
      %c0_17 = arith.constant 0 : index
      %c0_18 = arith.constant 0 : index
      %22 = vector.load %arg2[%c0_17, %c0_18] : memref<8x16xf32, #tpu.memory_space<vmem>>, vector<8x16xf32>
      %c0_19 = arith.constant 0 : index
      %c0_20 = arith.constant 0 : index
      %23 = vector.load %arg3[%c0_19, %c0_20] : memref<16x128xf32, #tpu.memory_space<vmem>>, vector<16x128xf32>
      %cst_21 = arith.constant dense<0.000000e+00> : vector<8x128xf32>
      %24 = tpu.matmul %22, %23, %cst_21 {dimension_numbers = #tpu.dot_dimension_numbers<[1], [0], [0], [1], [0, 0, 1, 1], [], []>} : vector<8x16xf32>, vector<16x128xf32>, vector<8x128xf32> -> vector<8x128xf32>
      %c0_22 = arith.constant 0 : index
      %c0_23 = arith.constant 0 : index
      %25 = vector.load %arg4[%c0_22, %c0_23] : memref<1x128xf32, #tpu.memory_space<vmem>>, vector<1x128xf32>
      %26 = vector.broadcast %25 : vector<1x128xf32> to vector<8x128xf32>
      %27 = arith.addf %24, %26 : vector<8x128xf32>
      %cst_24 = arith.constant 0.000000e+00 : f32
      %28 = vector.broadcast %cst_24 : f32 to vector<8x128xf32>
      %29 = arith.maximumf %27, %28 : vector<8x128xf32>
      %c0_25 = arith.constant 0 : index
      %c0_26 = arith.constant 0 : index
      %30 = vector.load %arg11[%c0_25, %c0_26] : memref<8x128xf32, #tpu.memory_space<vmem>>, vector<8x128xf32>
      tpu.vector_store %arg11[%c0_25, %c0_26], %29 {strides = array<i32>} : memref<8x128xf32, #tpu.memory_space<vmem>>, vector<8x128xf32>,
    } else {
    }
    %c0 = arith.constant 0 : index
    %c0_1 = arith.constant 0 : index
    %3 = vector.load %arg11[%c0, %c0_1] : memref<8x128xf32, #tpu.memory_space<vmem>>, vector<8x128xf32>
    %c0_2 = arith.constant 0 : index
    %c0_3 = arith.constant 0 : index
    %4 = vector.load %arg5[%c0_2, %c0_3] : memref<128x128xf32, #tpu.memory_space<vmem>>, vector<128x128xf32>
    %cst = arith.constant dense<0.000000e+00> : vector<8x128xf32>
    %5 = tpu.matmul %3, %4, %cst {dimension_numbers = #tpu.dot_dimension_numbers<[1], [0], [0], [1], [0, 0, 1, 1], [], []>} : vector<8x128xf32>, vector<128x128xf32>, vector<8x128xf32> -> vector<8x128xf32>
    %c0_4 = arith.constant 0 : index
    %c0_5 = arith.constant 0 : index
    %6 = vector.load %arg6[%c0_4, %c0_5] : memref<1x128xf32, #tpu.memory_space<vmem>>, vector<1x128xf32>
    %7 = vector.broadcast %6 : vector<1x128xf32> to vector<8x128xf32>
    %8 = arith.addf %5, %7 : vector<8x128xf32>
    %c0_6 = arith.constant 0 : index
    %c0_7 = arith.constant 0 : index
    %9 = vector.load %arg7[%c0_6, %c0_7] : memref<128x128xf32, #tpu.memory_space<vmem>>, vector<128x128xf32>
    %cst_8 = arith.constant dense<0.000000e+00> : vector<8x128xf32>
    %10 = tpu.matmul %3, %9, %cst_8 {dimension_numbers = #tpu.dot_dimension_numbers<[1], [0], [0], [1], [0, 0, 1, 1], [], []>} : vector<8x128xf32>, vector<128x128xf32>, vector<8x128xf32> -> vector<8x128xf32>
    %c0_9 = arith.constant 0 : index
    %c0_10 = arith.constant 0 : index
    %11 = vector.load %arg8[%c0_9, %c0_10] : memref<1x128xf32, #tpu.memory_space<vmem>>, vector<1x128xf32>
    %12 = vector.broadcast %11 : vector<1x128xf32> to vector<8x128xf32>
    %13 = arith.addf %10, %12 : vector<8x128xf32>
    %14 = math.tanh %8 : vector<8x128xf32>
    %c0_11 = arith.constant 0 : index
    %c0_12 = arith.constant 0 : index
    %15 = vector.load %arg9[%c0_11, %c0_12] : memref<8x128xf32, #tpu.memory_space<vmem>>, vector<8x128xf32>
    tpu.vector_store %arg9[%c0_11, %c0_12], %14 {strides = array<i32>} : memref<8x128xf32, #tpu.memory_space<vmem>>, vector<8x128xf32>,
    %cst_13 = arith.constant -1.000000e+01 : f32
    %cst_14 = arith.constant 2.000000e+00 : f32
    %16 = vector.broadcast %cst_13 : f32 to vector<8x128xf32>
    %17 = arith.maximumf %16, %13 : vector<8x128xf32>
    %18 = vector.broadcast %cst_14 : f32 to vector<8x128xf32>
    %19 = arith.minimumf %18, %17 : vector<8x128xf32>
    %20 = math.exp %19 : vector<8x128xf32>
    %c0_15 = arith.constant 0 : index
    %c0_16 = arith.constant 0 : index
    %21 = vector.load %arg10[%c0_15, %c0_16] : memref<8x128xf32, #tpu.memory_space<vmem>>, vector<8x128xf32>
    tpu.vector_store %arg10[%c0_15, %c0_16], %20 {strides = array<i32>} : memref<8x128xf32, #tpu.memory_space<vmem>>, vector<8x128xf32>,
    return
  }
  func.func @transform_0(%arg0: i32, %arg1: i32) -> (i32, i32) {
    %c0_i32 = arith.constant 0 : i32
    %c0_i32_0 = arith.constant 0 : i32
    return %arg0, %c0_i32 : i32, i32
  }
  func.func @transform_1(%arg0: i32, %arg1: i32) -> (i32, i32) {
    %c0_i32 = arith.constant 0 : i32
    %c0_i32_0 = arith.constant 0 : i32
    %c0_i32_1 = arith.constant 0 : i32
    return %c0_i32, %c0_i32_0 : i32, i32
  }
  func.func @transform_2(%arg0: i32, %arg1: i32) -> (i32, i32) {
    %c0_i32 = arith.constant 0 : i32
    %c0_i32_0 = arith.constant 0 : i32
    %c0_i32_1 = arith.constant 0 : i32
    return %c0_i32, %c0_i32_0 : i32, i32
  }
  func.func @transform_3(%arg0: i32, %arg1: i32) -> (i32, i32) {
    %c0_i32 = arith.constant 0 : i32
    %c0_i32_0 = arith.constant 0 : i32
    return %c0_i32, %arg1 : i32, i32
  }
  func.func @transform_4(%arg0: i32, %arg1: i32) -> (i32, i32) {
    %c0_i32 = arith.constant 0 : i32
    %c0_i32_0 = arith.constant 0 : i32
    return %c0_i32, %arg1 : i32, i32
  }
  func.func @transform_5(%arg0: i32, %arg1: i32) -> (i32, i32) {
    %c0_i32 = arith.constant 0 : i32
    %c0_i32_0 = arith.constant 0 : i32
    return %c0_i32, %arg1 : i32, i32
  }
  func.func @transform_6(%arg0: i32, %arg1: i32) -> (i32, i32) {
    %c0_i32 = arith.constant 0 : i32
    %c0_i32_0 = arith.constant 0 : i32
    return %c0_i32, %arg1 : i32, i32
  }
  func.func @transform_7(%arg0: i32, %arg1: i32) -> (i32, i32) {
    %c0_i32 = arith.constant 0 : i32
    return %arg0, %arg1 : i32, i32
  }
  func.func @transform_8(%arg0: i32, %arg1: i32) -> (i32, i32) {
    %c0_i32 = arith.constant 0 : i32
    return %arg0, %arg1 : i32, i32
  }
}

</mosaic_0001>

<bundles_post_ra>
// kernel: tpu_custom_call.1
= control target key start
LH: loop header
LB: loop body
LE: loop exit
PB: predicated region body
PF: predicated region fallthrough
CT: control target
= control target key end

     0   :  { %14 = vsyncpa [#allocation4], 0  ;;  %s890_s0 = inlined_call_operand.hbm [shape: f32[8,16], index: 0, kind: input, shape index: {}]   ;;  %s891_s1 = inlined_call_operand.hbm [shape: f32[16,128], index: 1, kind: input, shape index: {}]   ;;  %s892_s2 = inlined_call_operand.vmem [shape: f32[1,128], index: 2, kind: input, shape index: {}]   ;;  %s893_s3 = inlined_call_operand.hbm [shape: f32[128,128], index: 3, kind: input, shape index: {}]   ;;  %s894_s4 = inlined_call_operand.vmem [shape: f32[1,128], index: 4, kind: input, shape index: {}]   ;;  %s895_s5 = inlined_call_operand.hbm [shape: f32[128,128], index: 5, kind: input, shape index: {}]   ;;  %s896_s6 = inlined_call_operand.vmem [shape: f32[1,128], index: 6, kind: input, shape index: {}]   ;;  %s897_s7 = inlined_call_operand.hbm [shape: f32[8,128], index: 7, kind: output, shape index: {0}]   ;;  %s898_s8 = inlined_call_operand.hbm [shape: f32[8,128], index: 8, kind: output, shape index: {1}]  }
   0x1   :  { %15 = vsyncpa [#allocation7], 0 }
   0x2   :  { %16 = vsyncpa [#allocation10], 0 }
   0x3   :  { %17 = vsyncpa [#allocation5], 0 }
   0x4   :  { %18 = vsyncpa [#allocation13], 0  ;;  %s724_s27 = smov [#allocation6]   ;;  %s582_s9 = scalar_lea.hbm %s891_s1, 256 }
   0x5   :  { %s34_s28 = sshll.u32 %s724_s27, 4  ;;  %p583_p0 = scmp.ne.s32.totalorder %s891_s1, %s582_s9  ;;  %s35_s28 = int_to_ptr.vmem [resolvable:$true] %s34_s28 }
   0x6   :  { %p586_p1 = scmp.lt.u32.totalorder %s582_s9, %s891_s1 }
   0x8   :  { %p588_p2 = pnand %p586_p1, %p583_p0 }
   0xa   :  { %591 = shalt.err (!%p588_p2)
}
   0xb   :  { %s592_s14 = scalar_lea.vmem %s35_s28, 256  ;;  %p597_p4 = scmp.lt.s32.totalorder %s35_s28, %s35_s28 }
   0xc   :  { %p593_p3 = scmp.ne.s32.totalorder %s35_s28, %s592_s14  ;;  %p598_p5 = scmp.lt.s32.totalorder %s592_s14, %s592_s14 }
   0xe   :  { %p599_p6 = por %p598_p5, %p597_p4 }
  0x10   :  { %p600_p7 = pnand %p599_p6, %p593_p3 }
  0x12   :  { %603 = shalt.err (!%p600_p7)
}
  0x13   :  { %s725_s15 = smov 128   ;;  %s726_s16 = smov 8  }
  0x14   :  { %40 = dma.hbm_to_vmem [thread:$0]  %s891_s1, 256, %s35_s28, [#allocation7], %s725_s15, %s725_s15, %s726_s16  }
  0x15   :  { %s727_s19 = smov [#allocation3]   ;;  %s728_s21 = smov [#allocation8]  }
  0x16   :  { %s25_s20 = sshll.u32 %s727_s19, 4  ;;  %s48_s22 = sshll.u32 %s728_s21, 4  ;;  %s26_s20 = int_to_ptr.vmem [resolvable:$true] %s25_s20  ;;  %s49_s22 = int_to_ptr.vmem [resolvable:$true] %s48_s22 }
  0x17   :  { %s604_s25 = scalar_lea.hbm %s890_s0, 128 }
  0x18   :  { %p605_p8 = scmp.ne.s32.totalorder %s890_s0, %s604_s25  ;;  %p608_p9 = scmp.lt.u32.totalorder %s604_s25, %s890_s0 }
  0x1a   :  { %p610_p10 = pnand %p608_p9, %p605_p8 }
  0x1c   :  { %613 = shalt.err (!%p610_p10)
}
  0x1d   :  { %s614_s1 = scalar_lea.vmem %s26_s20, 128  ;;  %p619_p12 = scmp.lt.s32.totalorder %s26_s20, %s26_s20 }
  0x1e   :  { %p615_p11 = scmp.ne.s32.totalorder %s26_s20, %s614_s1  ;;  %p620_p13 = scmp.lt.s32.totalorder %s614_s1, %s614_s1 }
  0x20   :  { %p621_p0 = por %p620_p13, %p619_p12 }
  0x22   :  { %p622_p1 = pnand %p621_p0, %p615_p11 }
  0x24   :  { %625 = shalt.err (!%p622_p1)
}
  0x25   :  { %28 = dma.hbm_to_vmem [thread:$0]  %s890_s0, 128, %s26_s20, [#allocation4]  }
  0x26   :  { %s626_s12 = scalar_lea.hbm %s893_s3, 2048 }
  0x27   :  { %p627_p2 = scmp.ne.s32.totalorder %s893_s3, %s626_s12  ;;  %p630_p3 = scmp.lt.u32.totalorder %s626_s12, %s893_s3 }
  0x29   :  { %p632_p4 = pnand %p630_p3, %p627_p2 }
  0x2b   :  { %635 = shalt.err (!%p632_p4)
}
  0x2c   :  { %s636_s19 = scalar_lea.vmem %s49_s22, 2048  ;;  %p641_p6 = scmp.lt.s32.totalorder %s49_s22, %s49_s22 }
  0x2d   :  { %p637_p5 = scmp.ne.s32.totalorder %s49_s22, %s636_s19  ;;  %p642_p7 = scmp.lt.s32.totalorder %s636_s19, %s636_s19 }
  0x2f   :  { %p643_p8 = por %p642_p7, %p641_p6 }
  0x31   :  { %p644_p9 = pnand %p643_p8, %p637_p5 }
  0x33   :  { %647 = shalt.err (!%p644_p9)
}
  0x34   :  { %54 = dma.hbm_to_vmem [thread:$0]  %s893_s3, 2048, %s49_s22, [#allocation7], %s725_s15, %s725_s15, %s726_s16  }
  0x35   :  { %s729_s21 = smov [#allocation9]   ;;  %s648_s26 = scalar_lea.hbm %s895_s5, 2048 }
  0x36   :  { %s62_s23 = sshll.u32 %s729_s21, 4  ;;  %p649_p10 = scmp.ne.s32.totalorder %s895_s5, %s648_s26  ;;  %s63_s23 = int_to_ptr.vmem [resolvable:$true] %s62_s23 }
  0x37   :  { %p652_p11 = scmp.lt.u32.totalorder %s648_s26, %s895_s5 }
  0x39   :  { %p654_p12 = pnand %p652_p11, %p649_p10 }
  0x3b   :  { %657 = shalt.err (!%p654_p12)
}
  0x3c   :  { %s658_s28 = scalar_lea.vmem %s63_s23, 2048  ;;  %p663_p0 = scmp.lt.s32.totalorder %s63_s23, %s63_s23 }
  0x3d   :  { %p659_p13 = scmp.ne.s32.totalorder %s63_s23, %s658_s28  ;;  %p664_p1 = scmp.lt.s32.totalorder %s658_s28, %s658_s28 }
  0x3f   :  { %p665_p2 = por %p664_p1, %p663_p0 }
  0x41   :  { %p666_p3 = pnand %p665_p2, %p659_p13 }
  0x43   :  { %669 = shalt.err (!%p666_p3)
}
  0x44   :  { %68 = dma.hbm_to_vmem [thread:$0]  %s895_s5, 2048, %s63_s23, [#allocation10], %s725_s15, %s725_s15, %s726_s16  }
  0x45   :  { %714 = dma.done.wait [#allocation4], 128  }
  0x46   :  { %715 = vsyncadd [#allocation4], 4294967168 }
  0x47   :  { %716 = dma.done.wait [#allocation7], 2304  }
  0x48   :  { %717 = vsyncadd [#allocation7], 4294964992 }
  0x49   :  { %718 = dma.done.wait [#allocation10], 2048  }
  0x4a   :  { %719 = vsyncadd [#allocation10], 4294965248  ;;  %v730_v0 = vmov 0.0|0.0   ;;  %vm731_vm0 = vmmov 0   ;;  %v732_v1 = vmov 0.0   ;;  %v88_v2 = vld [vmem:[#allocation6] sm:$0xff] }
  0x4b   :  { %516 = vmatprep.subr.bf16.mxu0 %v730_v0  ;;  %443 = vmatprep.mubr.msk.f32.mxu0 %vm731_vm0, %v732_v1  ;;  %v89_v3 = vld [vmem:[#allocation6 + $0x8] sm:$0xff]  ;;  %v174_v5 = vld [vmem:[#allocation8] sm:$0xff]  ;;  %v175_v6 = vld [vmem:[#allocation8 + $0x8] sm:$0xff]  ;;  %vm97_vm1 = vcmask 130048  }
  0x4c   :  { %519 = vmatprep.subr.bf16.mxu1 %v730_v0  ;;  %478 = vmatprep.mubr.msk.f32.mxu1 %vm731_vm0, %v732_v1  ;;  %v517_v4 = vpack.c.bf16 %v89_v3, %v88_v2  ;;  %v267_v7 = vld [vmem:[#allocation9] sm:$0xff]  ;;  %v520_v8 = vpack.c.bf16 %v175_v6, %v174_v5  ;;  %v268_v9 = vld [vmem:[#allocation9 + $0x8] sm:$0xff]  ;;  %v176_v10 = vld [vmem:[#allocation8 + $0x10] sm:$0xff] }
  0x4d   :  { %v177_v11 = vld [vmem:[#allocation8 + $0x18] sm:$0xff]  ;;  %v87_v12 = vld [vmem:[#allocation3] sm:$0xff]  ;;  %v544_v13 = vpack.c.bf16 %v268_v9, %v267_v7  ;;  %v269_v15 = vld [vmem:[#allocation9 + $0x10] sm:$0xff] }
  0x4e   :  { %518 = vmatpush3.bf16.msra.mxu0 %v517_v4  ;;  %521 = vmatpush3.bf16.msra.mxu1 %v520_v8  ;;  %v523_v14 = vpack.c.bf16 %v177_v11, %v176_v10  ;;  %v270_v16 = vld [vmem:[#allocation9 + $0x18] sm:$0xff]  ;;  %v178_v17 = vld [vmem:[#allocation8 + $0x20] sm:$0xff]  ;;  %v179_v18 = vld [vmem:[#allocation8 + $0x28] sm:$0xff] }
  0x4f   :  { %543 = vmatprep.subr.bf16.mxu0 %v730_v0  ;;  %522 = vmatprep.subr.bf16.mxu1 %v730_v0  ;;  %v547_v19 = vpack.c.bf16 %v270_v16, %v269_v15  ;;  %v526_v20 = vpack.c.bf16 %v179_v18, %v178_v17  ;;  %v271_v21 = vld [vmem:[#allocation9 + $0x20] sm:$0xff]  ;;  %v272_v22 = vld [vmem:[#allocation9 + $0x28] sm:$0xff]  ;;  %v180_v23 = vld [vmem:[#allocation8 + $0x30] sm:$0xff] }
  0x50   :  { %v181_v24 = vld [vmem:[#allocation8 + $0x38] sm:$0xff]  ;;  %v550_v25 = vpack.c.bf16 %v272_v22, %v271_v21  ;;  %v273_v27 = vld [vmem:[#allocation9 + $0x30] sm:$0xff]  ;;  %v182_v29 = vld [vmem:[#allocation8 + $0x40] sm:$0xff] }
  0x51   :  { %444 = vmatmul.mubr.msk.f32.vlgmr.msra.gmra.mrb[0].mxu0 %vm97_vm1, %v87_v12  ;;  %v529_v26 = vpack.c.bf16 %v181_v24, %v180_v23  ;;  %v274_v28 = vld [vmem:[#allocation9 + $0x38] sm:$0xff]  ;;  %v183_v30 = vld [vmem:[#allocation8 + $0x48] sm:$0xff]  ;;  %v275_v33 = vld [vmem:[#allocation9 + $0x40] sm:$0xff] }
  0x52   :  { %545 = vmatpush3.bf16.msra.mxu0 %v544_v13  ;;  %513 = vmatprep.mubr.msk.f32.mxu0 %vm731_vm0, %v732_v1  ;;  %v553_v31 = vpack.c.bf16 %v274_v28, %v273_v27  ;;  %v532_v32 = vpack.c.bf16 %v183_v30, %v182_v29  ;;  %v276_v34 = vld [vmem:[#allocation9 + $0x48] sm:$0xff]  ;;  %v184_v35 = vld [vmem:[#allocation8 + $0x50] sm:$0xff]  ;;  %v185_v36 = vld [vmem:[#allocation8 + $0x58] sm:$0xff] }
  0x53   :  { %546 = vmatprep.subr.bf16.mxu0 %v730_v0  ;;  %524 = vmatpush3.bf16.msra.mxu1 %v523_v14  ;;  %v556_v37 = vpack.c.bf16 %v276_v34, %v275_v33  ;;  %v535_v38 = vpack.c.bf16 %v185_v36, %v184_v35  ;;  %v277_v39 = vld [vmem:[#allocation9 + $0x50] sm:$0xff]  ;;  %v278_v40 = vld [vmem:[#allocation9 + $0x58] sm:$0xff]  ;;  %v186_v41 = vld [vmem:[#allocation8 + $0x60] sm:$0xff] }
  0x54   :  { %525 = vmatprep.subr.bf16.mxu1 %v730_v0  ;;  %v187_v42 = vld [vmem:[#allocation8 + $0x68] sm:$0xff]  ;;  %v559_v43 = vpack.c.bf16 %v278_v40, %v277_v39  ;;  %v279_v45 = vld [vmem:[#allocation9 + $0x60] sm:$0xff]  ;;  %v188_v48 = vld [vmem:[#allocation8 + $0x70] sm:$0xff] }
  0x55   :  { %v538_v44 = vpack.c.bf16 %v187_v42, %v186_v41  ;;  %v280_v46 = vld [vmem:[#allocation9 + $0x68] sm:$0xff]  ;;  %v189_v49 = vld [vmem:[#allocation8 + $0x78] sm:$0xff]  ;;  %v281_v50 = vld [vmem:[#allocation9 + $0x70] sm:$0xff] }
  0x56   :  { %548 = vmatpush3.bf16.msra.mxu0 %v547_v19  ;;  %v562_v47 = vpack.c.bf16 %v280_v46, %v279_v45  ;;  %v541_v51 = vpack.c.bf16 %v189_v49, %v188_v48  ;;  %v282_v52 = vld [vmem:[#allocation9 + $0x78] sm:$0xff]  ;;  %v398_v54 = vld [vmem:[%s892_s2] ss:$0 sm:$0xff]  ;;  %s733_s2 = smov [#allocation11]  }
  0x57   :  { %549 = vmatprep.subr.bf16.mxu0 %v730_v0  ;;  %527 = vmatpush3.bf16.msra.mxu1 %v526_v20  ;;  %v565_v53 = vpack.c.bf16 %v282_v52, %v281_v50  ;;  %v400_v59 = vld [vmem:[%s894_s4] ss:$0 sm:$0xff]  ;;  %s373_s12 = sshll.u32 %s733_s2, 4  ;;  %s734_s4 = smov [#allocation12]   ;;  %s374_s12 = int_to_ptr.vmem [resolvable:$true] %s373_s12 }
  0x58   :  { %528 = vmatprep.subr.bf16.mxu1 %v730_v0  ;;  %v401_v60 = vld [vmem:[%s896_s6] ss:$0 sm:$0xff]  ;;  %s383_s13 = sshll.u32 %s734_s4, 4  ;;  %s670_s14 = scalar_lea.vmem %s374_s12, 128  ;;  %s384_s13 = int_to_ptr.vmem [resolvable:$true] %s383_s13 }
  0x59   :  { %p671_p4 = scmp.ne.s32.totalorder %s374_s12, %s670_s14  ;;  %p675_p5 = scmp.lt.s32.totalorder %s374_s12, %s374_s12 }
  0x5a   :  { %551 = vmatpush3.bf16.msra.mxu0 %v550_v25  ;;  %p676_p6 = scmp.lt.s32.totalorder %s670_s14, %s670_s14 }
  0x5b   :  { %552 = vmatprep.subr.bf16.mxu0 %v730_v0  ;;  %530 = vmatpush3.bf16.msra.mxu1 %v529_v26 }
  0x5c   :  { %531 = vmatprep.subr.bf16.mxu1 %v730_v0  ;;  %p677_p7 = por %p676_p6, %p675_p5 }
  0x5e   :  { %554 = vmatpush3.bf16.msra.mxu0 %v553_v31  ;;  %p678_p8 = pnand %p677_p7, %p671_p4 }
  0x5f   :  { %555 = vmatprep.subr.bf16.mxu0 %v730_v0  ;;  %533 = vmatpush3.bf16.msra.mxu1 %v532_v32 }
  0x60   :  { %534 = vmatprep.subr.bf16.mxu1 %v730_v0 }
  0x62   :  { %557 = vmatpush3.bf16.msra.mxu0 %v556_v37 }
  0x63   :  { %558 = vmatprep.subr.bf16.mxu0 %v730_v0  ;;  %536 = vmatpush3.bf16.msra.mxu1 %v535_v38 }
  0x64   :  { %537 = vmatprep.subr.bf16.mxu1 %v730_v0 }
  0x66   :  { %560 = vmatpush3.bf16.msra.mxu0 %v559_v43 }
  0x67   :  { %561 = vmatprep.subr.bf16.mxu0 %v730_v0  ;;  %539 = vmatpush3.bf16.msra.mxu1 %v538_v44 }
  0x68   :  { %540 = vmatprep.subr.bf16.mxu1 %v730_v0 }
  0x6a   :  { %563 = vmatpush3.bf16.msra.mxu0 %v562_v47 }
  0x6b   :  { %564 = vmatprep.subr.bf16.mxu0 %v730_v0  ;;  %542 = vmatpush3.bf16.msra.mxu1 %v541_v51 }
  0x6e   :  { %566 = vmatpush3.bf16.msra.mxu0 %v565_v53 }
 0x124   :  { %v167_v55 = vpop.f32.mrb[0].mxu0 }
 0x125   :  { %v168_v56 = vadd.f32 %v398_v54, %v167_v55  ;;  %v445_v57 = vpop.f32.mrb[1].mxu0 }
 0x127   :  { %v171_v58 = vmax.f32 %v168_v56, 0.0 }
 0x129   :  { %479 = vmatmul.mubr.f32.vlgmr.msra.gmra.mrb[0].mxu1 %v171_v58  ;;  %514 = vmatmul.mubr.f32.vlgmr.msra.gmra.mrb[2].mxu0 %v171_v58 }
 0x1fc   :  { %v263_v61 = vpop.f32.mrb[0].mxu1  ;;  %v356_v62 = vpop.f32.mrb[2].mxu0 }
 0x1fd   :  { %v264_v63 = vadd.f32 %v400_v59, %v263_v61  ;;  %v357_v0 = vadd.f32 %v401_v60, %v356_v62  ;;  %v480_v1 = vpop.f32.mrb[1].mxu1  ;;  %v515_v2 = vpop.f32.mrb[3].mxu0 }
 0x1ff   :  { %578 = vtanh.f32 %v264_v63  ;;  %v362_v3 = vmax.f32 %v357_v0, -10.0 }
 0x201   :  { %v363_v4 = vmin.f32 %v362_v3, 2.0 }
 0x203   :  { %v364_v5 = vmul.f32 1.442695, %v363_v4 }
 0x205   :  { %580 = vpow2.f32 %v364_v5 }
 0x209   :  { %v579_v6 = vpop.eup %578 }
 0x20a   :  { %361 = vst [vmem:[#allocation11] sm:$0xff] %v579_v6 }
 0x20b   :  { %681 = shalt.err (!%p678_p8)
}
 0x20c   :  { %s682_s18 = scalar_lea.hbm %s897_s7, 128 }
 0x20d   :  { %p683_p9 = scmp.ne.s32.totalorder %s897_s7, %s682_s18  ;;  %p686_p10 = scmp.lt.u32.totalorder %s682_s18, %s897_s7 }
 0x20f   :  { %p688_p11 = pnand %p686_p10, %p683_p9 }
 0x211   :  { %691 = shalt.err (!%p688_p11)
}
 0x212   :  { %376 = dma.vmem_to_hbm [thread:$0]  %s374_s12, 128, %s897_s7, [#allocation5]   ;;  %v581_v7 = vpop.eup %580 }
 0x213   :  { %366 = vst [vmem:[#allocation12] sm:$0xff] %v581_v7  ;;  %s692_s25 = scalar_lea.vmem %s384_s13, 128  ;;  %p697_p13 = scmp.lt.s32.totalorder %s384_s13, %s384_s13 }
 0x214   :  { %p693_p12 = scmp.ne.s32.totalorder %s384_s13, %s692_s25  ;;  %p698_p0 = scmp.lt.s32.totalorder %s692_s25, %s692_s25 }
 0x216   :  { %p699_p1 = por %p698_p0, %p697_p13 }
 0x218   :  { %p700_p2 = pnand %p699_p1, %p693_p12 }
 0x21a   :  { %703 = shalt.err (!%p700_p2)
}
 0x21b   :  { %s704_s29 = scalar_lea.hbm %s898_s8, 128 }
 0x21c   :  { %p705_p3 = scmp.ne.s32.totalorder %s898_s8, %s704_s29  ;;  %p708_p4 = scmp.lt.u32.totalorder %s704_s29, %s898_s8 }
 0x21e   :  { %p710_p5 = pnand %p708_p4, %p705_p3 }
 0x220   :  { %713 = shalt.err (!%p710_p5)
}
 0x221   :  { %386 = dma.vmem_to_hbm [thread:$0]  %s384_s13, 128, %s898_s8, [#allocation13]  }
 0x222   :  { %720 = dma.done.wait [#allocation5], 128  }
 0x223   :  { %721 = vsyncadd [#allocation5], 4294967168 }
 0x224   :  { %722 = dma.done.wait [#allocation13], 128  }
 0x225   :  { %723 = vsyncadd [#allocation13], 4294967168 }
 0x226   :  { %393 = vsyncpa [#allocation4], 1 }
 0x227   :  { %394 = vsyncpa [#allocation7], 1 }
 0x228   :  { %395 = vsyncpa [#allocation10], 1 }
 0x229   :  { %396 = vsyncpa [#allocation5], 1 }
 0x22a   :  { %397 = vsyncpa [#allocation13], 1 }

// kernel: tpu_custom_call.1
= control target key start
LH: loop header
LB: loop body
LE: loop exit
PB: predicated region body
PF: predicated region fallthrough
CT: control target
= control target key end

     0   :  { %14 = vsyncpa [#allocation4], 0  ;;  %s890_s0 = inlined_call_operand.hbm [shape: f32[8,16], index: 0, kind: input, shape index: {}]   ;;  %s891_s1 = inlined_call_operand.hbm [shape: f32[16,128], index: 1, kind: input, shape index: {}]   ;;  %s892_s2 = inlined_call_operand.vmem [shape: f32[1,128], index: 2, kind: input, shape index: {}]   ;;  %s893_s3 = inlined_call_operand.hbm [shape: f32[128,128], index: 3, kind: input, shape index: {}]   ;;  %s894_s4 = inlined_call_operand.vmem [shape: f32[1,128], index: 4, kind: input, shape index: {}]   ;;  %s895_s5 = inlined_call_operand.hbm [shape: f32[128,128], index: 5, kind: input, shape index: {}]   ;;  %s896_s6 = inlined_call_operand.vmem [shape: f32[1,128], index: 6, kind: input, shape index: {}]   ;;  %s897_s7 = inlined_call_operand.hbm [shape: f32[8,128], index: 7, kind: output, shape index: {0}]   ;;  %s898_s8 = inlined_call_operand.hbm [shape: f32[8,128], index: 8, kind: output, shape index: {1}]  }
   0x1   :  { %15 = vsyncpa [#allocation7], 0 }
   0x2   :  { %16 = vsyncpa [#allocation10], 0 }
   0x3   :  { %17 = vsyncpa [#allocation5], 0 }
   0x4   :  { %18 = vsyncpa [#allocation13], 0  ;;  %s724_s27 = smov [#allocation6]   ;;  %s582_s9 = scalar_lea.hbm %s891_s1, 256 }
   0x5   :  { %s34_s28 = sshll.u32 %s724_s27, 4  ;;  %p583_p0 = scmp.ne.s32.totalorder %s891_s1, %s582_s9  ;;  %s35_s28 = int_to_ptr.vmem [resolvable:$true] %s34_s28 }
   0x6   :  { %p586_p1 = scmp.lt.u32.totalorder %s582_s9, %s891_s1 }
   0x8   :  { %p588_p2 = pnand %p586_p1, %p583_p0 }
   0xa   :  { %591 = shalt.err (!%p588_p2)
}
   0xb   :  { %s592_s14 = scalar_lea.vmem %s35_s28, 256  ;;  %p597_p4 = scmp.lt.s32.totalorder %s35_s28, %s35_s28 }
   0xc   :  { %p593_p3 = scmp.ne.s32.totalorder %s35_s28, %s592_s14  ;;  %p598_p5 = scmp.lt.s32.totalorder %s592_s14, %s592_s14 }
   0xe   :  { %p599_p6 = por %p598_p5, %p597_p4 }
  0x10   :  { %p600_p7 = pnand %p599_p6, %p593_p3 }
  0x12   :  { %603 = shalt.err (!%p600_p7)
}
  0x13   :  { %s725_s15 = smov 128   ;;  %s726_s16 = smov 8  }
  0x14   :  { %40 = dma.hbm_to_vmem [thread:$0]  %s891_s1, 256, %s35_s28, [#allocation7], %s725_s15, %s725_s15, %s726_s16  }
  0x15   :  { %s727_s19 = smov [#allocation3]   ;;  %s728_s21 = smov [#allocation8]  }
  0x16   :  { %s25_s20 = sshll.u32 %s727_s19, 4  ;;  %s48_s22 = sshll.u32 %s728_s21, 4  ;;  %s26_s20 = int_to_ptr.vmem [resolvable:$true] %s25_s20  ;;  %s49_s22 = int_to_ptr.vmem [resolvable:$true] %s48_s22 }
  0x17   :  { %s604_s25 = scalar_lea.hbm %s890_s0, 128 }
  0x18   :  { %p605_p8 = scmp.ne.s32.totalorder %s890_s0, %s604_s25  ;;  %p608_p9 = scmp.lt.u32.totalorder %s604_s25, %s890_s0 }
  0x1a   :  { %p610_p10 = pnand %p608_p9, %p605_p8 }
  0x1c   :  { %613 = shalt.err (!%p610_p10)
}
  0x1d   :  { %s614_s1 = scalar_lea.vmem %s26_s20, 128  ;;  %p619_p12 = scmp.lt.s32.totalorder %s26_s20, %s26_s20 }
  0x1e   :  { %p615_p11 = scmp.ne.s32.totalorder %s26_s20, %s614_s1  ;;  %p620_p13 = scmp.lt.s32.totalorder %s614_s1, %s614_s1 }
  0x20   :  { %p621_p0 = por %p620_p13, %p619_p12 }
  0x22   :  { %p622_p1 = pnand %p621_p0, %p615_p11 }
  0x24   :  { %625 = shalt.err (!%p622_p1)
}
  0x25   :  { %28 = dma.hbm_to_vmem [thread:$0]  %s890_s0, 128, %s26_s20, [#allocation4]  }
  0x26   :  { %s626_s12 = scalar_lea.hbm %s893_s3, 2048 }
  0x27   :  { %p627_p2 = scmp.ne.s32.totalorder %s893_s3, %s626_s12  ;;  %p630_p3 = scmp.lt.u32.totalorder %s626_s12, %s893_s3 }
  0x29   :  { %p632_p4 = pnand %p630_p3, %p627_p2 }
  0x2b   :  { %635 = shalt.err (!%p632_p4)
}
  0x2c   :  { %s636_s19 = scalar_lea.vmem %s49_s22, 2048  ;;  %p641_p6 = scmp.lt.s32.totalorder %s49_s22, %s49_s22 }
  0x2d   :  { %p637_p5 = scmp.ne.s32.totalorder %s49_s22, %s636_s19  ;;  %p642_p7 = scmp.lt.s32.totalorder %s636_s19, %s636_s19 }
  0x2f   :  { %p643_p8 = por %p642_p7, %p641_p6 }
  0x31   :  { %p644_p9 = pnand %p643_p8, %p637_p5 }
  0x33   :  { %647 = shalt.err (!%p644_p9)
}
  0x34   :  { %54 = dma.hbm_to_vmem [thread:$0]  %s893_s3, 2048, %s49_s22, [#allocation7], %s725_s15, %s725_s15, %s726_s16  }
  0x35   :  { %s729_s21 = smov [#allocation9]   ;;  %s648_s26 = scalar_lea.hbm %s895_s5, 2048 }
  0x36   :  { %s62_s23 = sshll.u32 %s729_s21, 4  ;;  %p649_p10 = scmp.ne.s32.totalorder %s895_s5, %s648_s26  ;;  %s63_s23 = int_to_ptr.vmem [resolvable:$true] %s62_s23 }
  0x37   :  { %p652_p11 = scmp.lt.u32.totalorder %s648_s26, %s895_s5 }
  0x39   :  { %p654_p12 = pnand %p652_p11, %p649_p10 }
  0x3b   :  { %657 = shalt.err (!%p654_p12)
}
  0x3c   :  { %s658_s28 = scalar_lea.vmem %s63_s23, 2048  ;;  %p663_p0 = scmp.lt.s32.totalorder %s63_s23, %s63_s23 }
  0x3d   :  { %p659_p13 = scmp.ne.s32.totalorder %s63_s23, %s658_s28  ;;  %p664_p1 = scmp.lt.s32.totalorder %s658_s28, %s658_s28 }
  0x3f   :  { %p665_p2 = por %p664_p1, %p663_p0 }
  0x41   :  { %p666_p3 = pnand %p665_p2, %p659_p13 }
  0x43   :  { %669 = shalt.err (!%p666_p3)
}
  0x44   :  { %68 = dma.hbm_to_vmem [thread:$0]  %s895_s5, 2048, %s63_s23, [#allocation10], %s725_s15, %s725_s15, %s726_s16  }
  0x45   :  { %714 = dma.done.wait [#allocation4], 128  }
  0x46   :  { %715 = vsyncadd [#allocation4], 4294967168 }
  0x47   :  { %716 = dma.done.wait [#allocation7], 2304  }
  0x48   :  { %717 = vsyncadd [#allocation7], 4294964992 }
  0x49   :  { %718 = dma.done.wait [#allocation10], 2048  }
  0x4a   :  { %719 = vsyncadd [#allocation10], 4294965248  ;;  %v730_v0 = vmov 0.0|0.0   ;;  %vm731_vm0 = vmmov 0   ;;  %v732_v1 = vmov 0.0   ;;  %v88_v2 = vld [vmem:[#allocation6] sm:$0xff] }
  0x4b   :  { %516 = vmatprep.subr.bf16.mxu0 %v730_v0  ;;  %443 = vmatprep.mubr.msk.f32.mxu0 %vm731_vm0, %v732_v1  ;;  %v89_v3 = vld [vmem:[#allocation6 + $0x8] sm:$0xff]  ;;  %v174_v5 = vld [vmem:[#allocation8] sm:$0xff]  ;;  %v175_v6 = vld [vmem:[#allocation8 + $0x8] sm:$0xff]  ;;  %vm97_vm1 = vcmask 130048  }
  0x4c   :  { %519 = vmatprep.subr.bf16.mxu1 %v730_v0  ;;  %478 = vmatprep.mubr.msk.f32.mxu1 %vm731_vm0, %v732_v1  ;;  %v517_v4 = vpack.c.bf16 %v89_v3, %v88_v2  ;;  %v267_v7 = vld [vmem:[#allocation9] sm:$0xff]  ;;  %v520_v8 = vpack.c.bf16 %v175_v6, %v174_v5  ;;  %v268_v9 = vld [vmem:[#allocation9 + $0x8] sm:$0xff]  ;;  %v176_v10 = vld [vmem:[#allocation8 + $0x10] sm:$0xff] }
  0x4d   :  { %v177_v11 = vld [vmem:[#allocation8 + $0x18] sm:$0xff]  ;;  %v87_v12 = vld [vmem:[#allocation3] sm:$0xff]  ;;  %v544_v13 = vpack.c.bf16 %v268_v9, %v267_v7  ;;  %v269_v15 = vld [vmem:[#allocation9 + $0x10] sm:$0xff] }
  0x4e   :  { %518 = vmatpush3.bf16.msra.mxu0 %v517_v4  ;;  %521 = vmatpush3.bf16.msra.mxu1 %v520_v8  ;;  %v523_v14 = vpack.c.bf16 %v177_v11, %v176_v10  ;;  %v270_v16 = vld [vmem:[#allocation9 + $0x18] sm:$0xff]  ;;  %v178_v17 = vld [vmem:[#allocation8 + $0x20] sm:$0xff]  ;;  %v179_v18 = vld [vmem:[#allocation8 + $0x28] sm:$0xff] }
  0x4f   :  { %543 = vmatprep.subr.bf16.mxu0 %v730_v0  ;;  %522 = vmatprep.subr.bf16.mxu1 %v730_v0  ;;  %v547_v19 = vpack.c.bf16 %v270_v16, %v269_v15  ;;  %v526_v20 = vpack.c.bf16 %v179_v18, %v178_v17  ;;  %v271_v21 = vld [vmem:[#allocation9 + $0x20] sm:$0xff]  ;;  %v272_v22 = vld [vmem:[#allocation9 + $0x28] sm:$0xff]  ;;  %v180_v23 = vld [vmem:[#allocation8 + $0x30] sm:$0xff] }
  0x50   :  { %v181_v24 = vld [vmem:[#allocation8 + $0x38] sm:$0xff]  ;;  %v550_v25 = vpack.c.bf16 %v272_v22, %v271_v21  ;;  %v273_v27 = vld [vmem:[#allocation9 + $0x30] sm:$0xff]  ;;  %v182_v29 = vld [vmem:[#allocation8 + $0x40] sm:$0xff] }
  0x51   :  { %444 = vmatmul.mubr.msk.f32.vlgmr.msra.gmra.mrb[0].mxu0 %vm97_vm1, %v87_v12  ;;  %v529_v26 = vpack.c.bf16 %v181_v24, %v180_v23  ;;  %v274_v28 = vld [vmem:[#allocation9 + $0x38] sm:$0xff]  ;;  %v183_v30 = vld [vmem:[#allocation8 + $0x48] sm:$0xff]  ;;  %v275_v33 = vld [vmem:[#allocation9 + $0x40] sm:$0xff] }
  0x52   :  { %545 = vmatpush3.bf16.msra.mxu0 %v544_v13  ;;  %513 = vmatprep.mubr.msk.f32.mxu0 %vm731_vm0, %v732_v1  ;;  %v553_v31 = vpack.c.bf16 %v274_v28, %v273_v27  ;;  %v532_v32 = vpack.c.bf16 %v183_v30, %v182_v29  ;;  %v276_v34 = vld [vmem:[#allocation9 + $0x48] sm:$0xff]  ;;  %v184_v35 = vld [vmem:[#allocation8 + $0x50] sm:$0xff]  ;;  %v185_v36 = vld [vmem:[#allocation8 + $0x58] sm:$0xff] }
  0x53   :  { %546 = vmatprep.subr.bf16.mxu0 %v730_v0  ;;  %524 = vmatpush3.bf16.msra.mxu1 %v523_v14  ;;  %v556_v37 = vpack.c.bf16 %v276_v34, %v275_v33  ;;  %v535_v38 = vpack.c.bf16 %v185_v36, %v184_v35  ;;  %v277_v39 = vld [vmem:[#allocation9 + $0x50] sm:$0xff]  ;;  %v278_v40 = vld [vmem:[#allocation9 + $0x58] sm:$0xff]  ;;  %v186_v41 = vld [vmem:[#allocation8 + $0x60] sm:$0xff] }
  0x54   :  { %525 = vmatprep.subr.bf16.mxu1 %v730_v0  ;;  %v187_v42 = vld [vmem:[#allocation8 + $0x68] sm:$0xff]  ;;  %v559_v43 = vpack.c.bf16 %v278_v40, %v277_v39  ;;  %v279_v45 = vld [vmem:[#allocation9 + $0x60] sm:$0xff]  ;;  %v188_v48 = vld [vmem:[#allocation8 + $0x70] sm:$0xff] }
  0x55   :  { %v538_v44 = vpack.c.bf16 %v187_v42, %v186_v41  ;;  %v280_v46 = vld [vmem:[#allocation9 + $0x68] sm:$0xff]  ;;  %v189_v49 = vld [vmem:[#allocation8 + $0x78] sm:$0xff]  ;;  %v281_v50 = vld [vmem:[#allocation9 + $0x70] sm:$0xff] }
  0x56   :  { %548 = vmatpush3.bf16.msra.mxu0 %v547_v19  ;;  %v562_v47 = vpack.c.bf16 %v280_v46, %v279_v45  ;;  %v541_v51 = vpack.c.bf16 %v189_v49, %v188_v48  ;;  %v282_v52 = vld [vmem:[#allocation9 + $0x78] sm:$0xff]  ;;  %v398_v54 = vld [vmem:[%s892_s2] ss:$0 sm:$0xff]  ;;  %s733_s2 = smov [#allocation11]  }
  0x57   :  { %549 = vmatprep.subr.bf16.mxu0 %v730_v0  ;;  %527 = vmatpush3.bf16.msra.mxu1 %v526_v20  ;;  %v565_v53 = vpack.c.bf16 %v282_v52, %v281_v50  ;;  %v400_v59 = vld [vmem:[%s894_s4] ss:$0 sm:$0xff]  ;;  %s373_s12 = sshll.u32 %s733_s2, 4  ;;  %s734_s4 = smov [#allocation12]   ;;  %s374_s12 = int_to_ptr.vmem [resolvable:$true] %s373_s12 }
  0x58   :  { %528 = vmatprep.subr.bf16.mxu1 %v730_v0  ;;  %v401_v60 = vld [vmem:[%s896_s6] ss:$0 sm:$0xff]  ;;  %s383_s13 = sshll.u32 %s734_s4, 4  ;;  %s670_s14 = scalar_lea.vmem %s374_s12, 128  ;;  %s384_s13 = int_to_ptr.vmem [resolvable:$true] %s383_s13 }
  0x59   :  { %p671_p4 = scmp.ne.s32.totalorder %s374_s12, %s670_s14  ;;  %p675_p5 = scmp.lt.s32.totalorder %s374_s12, %s374_s12 }
  0x5a   :  { %551 = vmatpush3.bf16.msra.mxu0 %v550_v25  ;;  %p676_p6 = scmp.lt.s32.totalorder %s670_s14, %s670_s14 }
  0x5b   :  { %552 = vmatprep.subr.bf16.mxu0 %v730_v0  ;;  %530 = vmatpush3.bf16.msra.mxu1 %v529_v26 }
  0x5c   :  { %531 = vmatprep.subr.bf16.mxu1 %v730_v0  ;;  %p677_p7 = por %p676_p6, %p675_p5 }
  0x5e   :  { %554 = vmatpush3.bf16.msra.mxu0 %v553_v31  ;;  %p678_p8 = pnand %p677_p7, %p671_p4 }
  0x5f   :  { %555 = vmatprep.subr.bf16.mxu0 %v730_v0  ;;  %533 = vmatpush3.bf16.msra.mxu1 %v532_v32 }
  0x60   :  { %534 = vmatprep.subr.bf16.mxu1 %v730_v0 }
  0x62   :  { %557 = vmatpush3.bf16.msra.mxu0 %v556_v37 }
  0x63   :  { %558 = vmatprep.subr.bf16.mxu0 %v730_v0  ;;  %536 = vmatpush3.bf16.msra.mxu1 %v535_v38 }
  0x64   :  { %537 = vmatprep.subr.bf16.mxu1 %v730_v0 }
  0x66   :  { %560 = vmatpush3.bf16.msra.mxu0 %v559_v43 }
  0x67   :  { %561 = vmatprep.subr.bf16.mxu0 %v730_v0  ;;  %539 = vmatpush3.bf16.msra.mxu1 %v538_v44 }
  0x68   :  { %540 = vmatprep.subr.bf16.mxu1 %v730_v0 }
  0x6a   :  { %563 = vmatpush3.bf16.msra.mxu0 %v562_v47 }
  0x6b   :  { %564 = vmatprep.subr.bf16.mxu0 %v730_v0  ;;  %542 = vmatpush3.bf16.msra.mxu1 %v541_v51 }
  0x6e   :  { %566 = vmatpush3.bf16.msra.mxu0 %v565_v53 }
 0x124   :  { %v167_v55 = vpop.f32.mrb[0].mxu0 }
 0x125   :  { %v168_v56 = vadd.f32 %v398_v54, %v167_v55  ;;  %v445_v57 = vpop.f32.mrb[1].mxu0 }
 0x127   :  { %v171_v58 = vmax.f32 %v168_v56, 0.0 }
 0x129   :  { %479 = vmatmul.mubr.f32.vlgmr.msra.gmra.mrb[0].mxu1 %v171_v58  ;;  %514 = vmatmul.mubr.f32.vlgmr.msra.gmra.mrb[2].mxu0 %v171_v58 }
 0x1fc   :  { %v263_v61 = vpop.f32.mrb[0].mxu1  ;;  %v356_v62 = vpop.f32.mrb[2].mxu0 }
 0x1fd   :  { %v264_v63 = vadd.f32 %v400_v59, %v263_v61  ;;  %v357_v0 = vadd.f32 %v401_v60, %v356_v62  ;;  %v480_v1 = vpop.f32.mrb[1].mxu1  ;;  %v515_v2 = vpop.f32.mrb[3].mxu0 }
 0x1ff   :  { %578 = vtanh.f32 %v264_v63  ;;  %v362_v3 = vmax.f32 %v357_v0, -10.0 }
 0x201   :  { %v363_v4 = vmin.f32 %v362_v3, 2.0 }
 0x203   :  { %v364_v5 = vmul.f32 1.442695, %v363_v4 }
 0x205   :  { %580 = vpow2.f32 %v364_v5 }
 0x209   :  { %v579_v6 = vpop.eup %578 }
 0x20a   :  { %361 = vst [vmem:[#allocation11] sm:$0xff] %v579_v6 }
 0x20b   :  { %681 = shalt.err (!%p678_p8)
}
 0x20c   :  { %s682_s18 = scalar_lea.hbm %s897_s7, 128 }
 0x20d   :  { %p683_p9 = scmp.ne.s32.totalorder %s897_s7, %s682_s18  ;;  %p686_p10 = scmp.lt.u32.totalorder %s682_s18, %s897_s7 }
 0x20f   :  { %p688_p11 = pnand %p686_p10, %p683_p9 }
 0x211   :  { %691 = shalt.err (!%p688_p11)
}
 0x212   :  { %376 = dma.vmem_to_hbm [thread:$0]  %s374_s12, 128, %s897_s7, [#allocation5]   ;;  %v581_v7 = vpop.eup %580 }
 0x213   :  { %366 = vst [vmem:[#allocation12] sm:$0xff] %v581_v7  ;;  %s692_s25 = scalar_lea.vmem %s384_s13, 128  ;;  %p697_p13 = scmp.lt.s32.totalorder %s384_s13, %s384_s13 }
 0x214   :  { %p693_p12 = scmp.ne.s32.totalorder %s384_s13, %s692_s25  ;;  %p698_p0 = scmp.lt.s32.totalorder %s692_s25, %s692_s25 }
 0x216   :  { %p699_p1 = por %p698_p0, %p697_p13 }
 0x218   :  { %p700_p2 = pnand %p699_p1, %p693_p12 }
 0x21a   :  { %703 = shalt.err (!%p700_p2)
}
 0x21b   :  { %s704_s29 = scalar_lea.hbm %s898_s8, 128 }
 0x21c   :  { %p705_p3 = scmp.ne.s32.totalorder %s898_s8, %s704_s29  ;;  %p708_p4 = scmp.lt.u32.totalorder %s704_s29, %s898_s8 }
 0x21e   :  { %p710_p5 = pnand %p708_p4, %p705_p3 }
 0x220   :  { %713 = shalt.err (!%p710_p5)
}
 0x221   :  { %386 = dma.vmem_to_hbm [thread:$0]  %s384_s13, 128, %s898_s8, [#allocation13]  }
 0x222   :  { %720 = dma.done.wait [#allocation5], 128  }
 0x223   :  { %721 = vsyncadd [#allocation5], 4294967168 }
 0x224   :  { %722 = dma.done.wait [#allocation13], 128  }
 0x225   :  { %723 = vsyncadd [#allocation13], 4294967168 }
 0x226   :  { %393 = vsyncpa [#allocation4], 1 }
 0x227   :  { %394 = vsyncpa [#allocation7], 1 }
 0x228   :  { %395 = vsyncpa [#allocation10], 1 }
 0x229   :  { %396 = vsyncpa [#allocation5], 1 }
 0x22a   :  { %397 = vsyncpa [#allocation13], 1 }

</bundles_post_ra>
